<compile_context>
chip_gen: v7x
topology: tpu7x:2x2x1
jax: 0.10.0
libtpu: 0.0.40
codegen_flags: <defaults>
</compile_context>

<pallas_src>
import math
import functools

import jax
import jax.numpy as jnp
from jax.experimental import pallas as pl
from jax.experimental.pallas import tpu as pltpu


_INV_SQRT2 = 1.0 / math.sqrt(2.0)
_MIB = 1024 * 1024
# Contract x's D (dim 1) with w1t's D (dim 1): x @ w1t.T on the MXU (trans_b).
_FC1_DIMS = (((1,), (1,)), ((), ()))


def _ffn_kernel(x_ref, w1t_ref, b1_ref, w2_ref, b2_ref, o_ref, acc_ref):
    # Grid: (row tiles, F tiles). The F axis is a reduction over the hidden dim.
    #   x_ref:   (tm, Dp)   row tile (resident across the F axis)
    #   w1t_ref: (tf, Dp)   fc1 weight slab, (out, in) layout -> row-contiguous DMA
    #   b1_ref:  (1, tf)    fc1 bias slab (f32)
    #   w2_ref:  (tf, Dp)   fc2 weight slab, (in, out) layout
    #   b2_ref:  (1, Dp)    fc2 bias (f32)
    #   o_ref:   (tm, Dp)   output tile (written on the last F step)
    #   acc_ref: (tm, Dp)   f32 accumulator scratch
    f = pl.program_id(1)

    @pl.when(f == 0)
    def _():
        acc_ref[...] = jnp.zeros_like(acc_ref)

    # fc1 partial: native-dtype (bf16) MXU operands, f32 accumulation.
    h = jax.lax.dot_general(x_ref[...], w1t_ref[...], _FC1_DIMS,
                            preferred_element_type=jnp.float32)
    h = h + b1_ref[...]

    # Exact (erf) GELU -- matches torch.nn.GELU() default.
    h = 0.5 * h * (1.0 + jax.lax.erf(h * _INV_SQRT2))

    # fc2 partial: accumulate this F slab's contribution in f32.
    acc_ref[...] += jnp.dot(h.astype(w2_ref.dtype), w2_ref[...],
                            preferred_element_type=jnp.float32)

    @pl.when(f == pl.num_programs(1) - 1)
    def _():
        # TODO(synk): dropout is identity here (inference mode); training-mode
        # dropout would use pltpu.prng_seed + pltpu.prng_random_bits for a mask.
        o_ref[...] = (acc_ref[...] + b2_ref[...]).astype(o_ref.dtype)


def _round_up(x, m):
    return ((x + m - 1) // m) * m


def _cdiv(a, b):
    return (a + b - 1) // b


def _vmem_capacity_bytes():
    """Best-effort VMEM capacity query with safe fallbacks."""
    try:
        return int(pltpu.get_tpu_info().vmem_capacity_bytes)
    except Exception:
        pass
    try:
        kind = jax.devices()[0].device_kind.lower()
        if "v7" in kind:
            return 64 * _MIB
        return 128 * _MIB            # v4 / v5e / v6e class parts
    except Exception:
        return 64 * _MIB             # conservative default


def _chip_config():
    cap = _vmem_capacity_bytes()
    if cap >= 96 * _MIB:
        # 128 MiB VMEM parts (v5e / v6e): one TensorCore; large row tile and
        # large F slab -- spend the VMEM headroom instead of capping at 64 MiB.
        return dict(tm=768, tf=1024, vmem_limit=100 * _MIB, min_row_tiles=1)
    # 64 MiB-per-TC parts (v7x-class): keep tm large (arithmetic intensity is
    # ~tm flop/B of weight traffic) but shrink tf; leave headroom for Mosaic
    # internal scratch; 2 TCs -> ensure >= 2 row tiles.
    return dict(tm=512, tf=256, vmem_limit=52 * _MIB, min_row_tiles=2)


def _vmem_footprint(tm, tf, dp, x_bytes, w_bytes, out_bytes):
    """Double-buffered block footprint + scratch, in bytes."""
    return (2 * tm * dp * x_bytes          # x tiles
            + 2 * tf * dp * w_bytes        # W1^T slabs
            + 2 * tf * dp * w_bytes        # W2 slabs
            + 2 * 8 * tf * 4               # b1 slabs (sublane-padded, f32)
            + 2 * 8 * dp * 4               # b2 (f32)
            + 2 * tm * dp * out_bytes      # output tiles
            + tm * dp * 4)                 # f32 accumulator scratch


@functools.partial(jax.jit, static_argnames=("mxu_dtype", "tm", "tf"))
def feed_forward_layer(x, w1, b1, w2, b2, *, mxu_dtype=jnp.bfloat16,
                       tm=None, tf=None):
    """FeedForward: dropout(fc2(gelu(fc1(x)))), dropout in eval mode.

    Args:
      x:  (B, T, D)
      w1: (F, D)  fc1 weight in native PyTorch layout (out_features, in_features)
      b1: (F,)
      w2: (F, D)  fc2 weight TRANSPOSED, i.e. torch fc2.weight.T (in, out) layout
      b2: (D,)
      mxu_dtype: dtype for MXU operands (x/W1/W2); None keeps the input dtype.
      tm, tf: optional row-tile / hidden-tile overrides (else chosen per chip).
    """
    B, T, D = x.shape
    F = w1.shape[0]
    M = B * T
    out_dtype = x.dtype

    cfg = _chip_config()
    tm_target = tm if tm is not None else cfg["tm"]
    tf_target = tf if tf is not None else cfg["tf"]

    # ---- static tile selection ----
    Dp = max(_round_up(D, 128), 128)                     # lane-dense output
    tm_eff = max(min(tm_target, _round_up(M, 16)), 16)
    if cfg["min_row_tiles"] > 1 and M > 16:              # keep both v7x TCs busy
        tm_eff = min(tm_eff, max(16, _round_up(_cdiv(M, cfg["min_row_tiles"]), 16)))
    tf_eff = max(min(tf_target, _round_up(F, 128)), 128)

    op_bytes = (jnp.dtype(mxu_dtype).itemsize if mxu_dtype is not None
                else jnp.dtype(x.dtype).itemsize)
    out_bytes = jnp.dtype(out_dtype).itemsize
    tile_budget = cfg["vmem_limit"] - 6 * _MIB           # Mosaic scratch headroom

    def fits(tm_, tf_):
        return _vmem_footprint(tm_, tf_, Dp, op_bytes, op_bytes, out_bytes) <= tile_budget

    while not fits(tm_eff, tf_eff) and tf_eff > 128:     # shrink tf first
        tf_eff = max(128, (tf_eff // 2) // 128 * 128)
    while not fits(tm_eff, tf_eff) and tm_eff > 16:      # then tm
        tm_eff = max(16, _round_up(tm_eff // 2, 16))

    Fp = _round_up(F, tf_eff)

    # ---- operand prep (no M padding: ragged last row tile instead) ----
    x2d = x.reshape(M, D)
    if Dp != D:
        x2d = jnp.pad(x2d, ((0, 0), (0, Dp - D)))
    w1p = jnp.pad(w1, ((0, Fp - F), (0, Dp - D))) if (Fp, Dp) != (F, D) else w1
    w2p = jnp.pad(w2, ((0, Fp - F), (0, Dp - D))) if (Fp, Dp) != (F, D) else w2
    if mxu_dtype is not None:
        x2d = x2d.astype(mxu_dtype)
        w1p = w1p.astype(mxu_dtype)
        w2p = w2p.astype(mxu_dtype)
    b1p = jnp.pad(b1.astype(jnp.float32), (0, Fp - F)).reshape(1, Fp)
    b2p = jnp.pad(b2.astype(jnp.float32), (0, Dp - D)).reshape(1, Dp)

    grid = (_cdiv(M, tm_eff), Fp // tf_eff)

    out2d = pl.pallas_call(
        _ffn_kernel,
        out_shape=jax.ShapeDtypeStruct((M, Dp), out_dtype),
        grid_spec=pltpu.PrefetchScalarGridSpec(
            num_scalar_prefetch=0,
            grid=grid,
            in_specs=[
                pl.BlockSpec((tm_eff, Dp), lambda i, f: (i, 0)),   # x row tile
                pl.BlockSpec((tf_eff, Dp), lambda i, f: (f, 0)),   # W1^T F-slab
                pl.BlockSpec((1, tf_eff), lambda i, f: (0, f)),    # b1 F-slab
                pl.BlockSpec((tf_eff, Dp), lambda i, f: (f, 0)),   # W2 F-slab
                pl.BlockSpec((1, Dp), lambda i, f: (0, 0)),        # b2
            ],
            out_specs=pl.BlockSpec((tm_eff, Dp), lambda i, f: (i, 0)),
            scratch_shapes=[pltpu.VMEM((tm_eff, Dp), jnp.float32)],
        ),
        compiler_params=pltpu.CompilerParams(
            dimension_semantics=("parallel", "arbitrary"),
            vmem_limit_bytes=int(cfg["vmem_limit"]),
        ),
    )(x2d, w1p, b1p, w2p, b2p)

    return out2d[:, :D].reshape(B, T, D)


def _init_linear_pt(key, in_dim, out_dim, dtype=jnp.float32):
    """nn.Linear-style init; returns weight in PyTorch (out_dim, in_dim) layout."""
    kw, kb = jax.random.split(key)
    bound = 1.0 / math.sqrt(in_dim)
    w = jax.random.uniform(kw, (out_dim, in_dim), dtype, -bound, bound)
    b = jax.random.uniform(kb, (out_dim,), dtype, -bound, bound)
    return w, b


def _reference(x, w1, b1, w2, b2, mxu_dtype=jnp.bfloat16):
    """Pure-JAX reference with the same mixed-precision policy as the kernel.

    w1: (F, D) PyTorch layout, w2: (F, D) = fc2.weight.T.
    """
    f32 = jnp.float32
    if mxu_dtype is not None:
        x, w1, w2 = x.astype(mxu_dtype), w1.astype(mxu_dtype), w2.astype(mxu_dtype)
    h = jnp.einsum("btd,fd->btf", x.astype(f32), w1.astype(f32)) + b1.astype(f32)
    h = 0.5 * h * (1.0 + jax.lax.erf(h * _INV_SQRT2))
    if mxu_dtype is not None:
        h = h.astype(mxu_dtype)
    out = jnp.einsum("btf,fd->btd", h.astype(f32), w2.astype(f32)) + b2.astype(f32)
    return out


if __name__ == "__main__":
    key = jax.random.PRNGKey(0)
    k_x, k_fc1, k_fc2, k_x2, k_fc3, k_fc4 = jax.random.split(key, 6)

    # Small demo shape consistent with (batch, num_tokens, token_dim).
    batch, num_tokens, token_dim = 2, 8, 32
    feedforward_dim = token_dim * 4  # module default: input_dim * 4

    x = jax.random.normal(k_x, (batch, num_tokens, token_dim), jnp.float32)
    w1, b1 = _init_linear_pt(k_fc1, token_dim, feedforward_dim)     # (F, D)
    w2_pt, b2 = _init_linear_pt(k_fc2, feedforward_dim, token_dim)  # (D, F) PyTorch
    w2 = w2_pt.T                                                    # (F, D) for kernel

    out = feed_forward_layer(x, w1, b1, w2, b2)
    jax.block_until_ready(out)
    ref = _reference(x, w1, b1, w2, b2)
    assert out.shape == (batch, num_tokens, token_dim)
    assert jnp.allclose(out, ref, atol=1e-2, rtol=1e-2), float(jnp.max(jnp.abs(out - ref)))

    # Larger shape to exercise the F-reduction axis and multiple row tiles.
    B2, T2, D2, F2 = 4, 64, 256, 2048
    x_big = jax.random.normal(k_x2, (B2, T2, D2), jnp.float32)
    w1b, b1b = _init_linear_pt(k_fc3, D2, F2)                       # (F2, D2)
    w2b_pt, b2b = _init_linear_pt(k_fc4, F2, D2)                    # (D2, F2)
    w2b = w2b_pt.T                                                  # (F2, D2)
    out_big = feed_forward_layer(x_big, w1b, b1b, w2b, b2b)
    jax.block_until_ready(out_big)
    ref_big = _reference(x_big, w1b, b1b, w2b, b2b)
    assert out_big.shape == (B2, T2, D2)
    assert jnp.allclose(out_big, ref_big, atol=2e-2, rtol=2e-2), \
        float(jnp.max(jnp.abs(out_big - ref_big)))

    print("KERNEL_OK")
</pallas_src>

<mosaic_0001>
module attributes {stable_mosaic.version = 11 : i64} {
  func.func @_ffn_kernel(%arg0: i32, %arg1: i32, %arg2: memref<16x128xbf16, #tpu.memory_space<vmem>>, %arg3: memref<128x128xbf16, #tpu.memory_space<vmem>>, %arg4: memref<1x128xf32, #tpu.memory_space<vmem>>, %arg5: memref<128x128xbf16, #tpu.memory_space<vmem>>, %arg6: memref<1x128xf32, #tpu.memory_space<vmem>>, %arg7: memref<16x128xf32, #tpu.memory_space<vmem>>, %arg8: memref<16x128xf32, #tpu.memory_space<vmem>>) attributes {dimension_semantics = [#tpu.dimension_semantics<parallel>, #tpu.dimension_semantics<arbitrary>], iteration_bounds = array<i64: 1, 1>, scalar_prefetch = 0 : i64, scratch_operands = 1 : i64, tpu.core_type = #tpu.core_type<tc>, window_params = [{transform_indices = @transform_0, window_bounds = array<i64: 16, 128>}, {transform_indices = @transform_1, window_bounds = array<i64: 128, 128>}, {transform_indices = @transform_2, window_bounds = array<i64: 1, 128>}, {transform_indices = @transform_3, window_bounds = array<i64: 128, 128>}, {pipeline_mode = #tpu.pipeline_mode<synchronous>, transform_indices = @transform_4, window_bounds = array<i64: 1, 128>}, {transform_indices = @transform_5, window_bounds = array<i64: 16, 128>}]} {
    %c0_i32 = arith.constant 0 : i32
    %0 = arith.cmpi eq, %arg1, %c0_i32 : i32
    %1 = arith.extui %0 : i1 to i32
    %c0_i32_0 = arith.constant 0 : i32
    %2 = arith.cmpi ne, %1, %c0_i32_0 : i32
    scf.if %2 {
      %cst_18 = arith.constant 0.000000e+00 : f32
      %26 = vector.broadcast %cst_18 : f32 to vector<16x128xf32>
      %c0_19 = arith.constant 0 : index
      %c0_20 = arith.constant 0 : index
      %27 = vector.load %arg8[%c0_19, %c0_20] : memref<16x128xf32, #tpu.memory_space<vmem>>, vector<16x128xf32>
      tpu.vector_store %arg8[%c0_19, %c0_20], %26 {strides = array<i32>} : memref<16x128xf32, #tpu.memory_space<vmem>>, vector<16x128xf32>,
    } else {
    }
    %c0 = arith.constant 0 : index
    %c0_1 = arith.constant 0 : index
    %3 = vector.load %arg2[%c0, %c0_1] : memref<16x128xbf16, #tpu.memory_space<vmem>>, vector<16x128xbf16>
    %c0_2 = arith.constant 0 : index
    %c0_3 = arith.constant 0 : index
    %4 = vector.load %arg3[%c0_2, %c0_3] : memref<128x128xbf16, #tpu.memory_space<vmem>>, vector<128x128xbf16>
    %cst = arith.constant dense<0.000000e+00> : vector<16x128xf32>
    %5 = tpu.matmul %3, %4, %cst {dimension_numbers = #tpu.dot_dimension_numbers<[1], [1], [0], [0], [0, 0, 1, 0], [], []>} : vector<16x128xbf16>, vector<128x128xbf16>, vector<16x128xf32> -> vector<16x128xf32>
    %c0_4 = arith.constant 0 : index
    %c0_5 = arith.constant 0 : index
    %6 = vector.load %arg4[%c0_4, %c0_5] : memref<1x128xf32, #tpu.memory_space<vmem>>, vector<1x128xf32>
    %7 = vector.broadcast %6 : vector<1x128xf32> to vector<16x128xf32>
    %8 = arith.addf %5, %7 : vector<16x128xf32>
    %cst_6 = arith.constant 5.000000e-01 : f32
    %9 = vector.broadcast %cst_6 : f32 to vector<16x128xf32>
    %10 = arith.mulf %9, %8 : vector<16x128xf32>
    %cst_7 = arith.constant 0.707106769 : f32
    %11 = vector.broadcast %cst_7 : f32 to vector<16x128xf32>
    %12 = arith.mulf %8, %11 : vector<16x128xf32>
    %13 = math.erf %12 : vector<16x128xf32>
    %cst_8 = arith.constant 1.000000e+00 : f32
    %14 = vector.broadcast %cst_8 : f32 to vector<16x128xf32>
    %15 = arith.addf %14, %13 : vector<16x128xf32>
    %16 = arith.mulf %10, %15 : vector<16x128xf32>
    %c0_9 = arith.constant 0 : index
    %c0_10 = arith.constant 0 : index
    %17 = vector.load %arg8[%c0_9, %c0_10] : memref<16x128xf32, #tpu.memory_space<vmem>>, vector<16x128xf32>
    %18 = arith.truncf %16 : vector<16x128xf32> to vector<16x128xbf16>
    %c0_11 = arith.constant 0 : index
    %c0_12 = arith.constant 0 : index
    %19 = vector.load %arg5[%c0_11, %c0_12] : memref<128x128xbf16, #tpu.memory_space<vmem>>, vector<128x128xbf16>
    %cst_13 = arith.constant dense<0.000000e+00> : vector<16x128xf32>
    %20 = tpu.matmul %18, %19, %cst_13 {dimension_numbers = #tpu.dot_dimension_numbers<[1], [0], [0], [1], [0, 0, 1, 1], [], []>} : vector<16x128xbf16>, vector<128x128xbf16>, vector<16x128xf32> -> vector<16x128xf32>
    %21 = arith.addf %17, %20 : vector<16x128xf32>
    %c0_14 = arith.constant 0 : index
    %c0_15 = arith.constant 0 : index
    %22 = vector.load %arg8[%c0_14, %c0_15] : memref<16x128xf32, #tpu.memory_space<vmem>>, vector<16x128xf32>
    tpu.vector_store %arg8[%c0_14, %c0_15], %21 {strides = array<i32>} : memref<16x128xf32, #tpu.memory_space<vmem>>, vector<16x128xf32>,
    %c0_i32_16 = arith.constant 0 : i32
    %23 = arith.cmpi eq, %arg1, %c0_i32_16 : i32
    %24 = arith.extui %23 : i1 to i32
    %c0_i32_17 = arith.constant 0 : i32
    %25 = arith.cmpi ne, %24, %c0_i32_17 : i32
    scf.if %25 {
      %c0_18 = arith.constant 0 : index
      %c0_19 = arith.constant 0 : index
      %26 = vector.load %arg8[%c0_18, %c0_19] : memref<16x128xf32, #tpu.memory_space<vmem>>, vector<16x128xf32>
      %c0_20 = arith.constant 0 : index
      %c0_21 = arith.constant 0 : index
      %27 = vector.load %arg6[%c0_20, %c0_21] : memref<1x128xf32, #tpu.memory_space<vmem>>, vector<1x128xf32>
      %28 = vector.broadcast %27 : vector<1x128xf32> to vector<16x128xf32>
      %29 = arith.addf %26, %28 : vector<16x128xf32>
      %c0_22 = arith.constant 0 : index
      %c0_23 = arith.constant 0 : index
      %30 = vector.load %arg7[%c0_22, %c0_23] : memref<16x128xf32, #tpu.memory_space<vmem>>, vector<16x128xf32>
      tpu.vector_store %arg7[%c0_22, %c0_23], %29 {strides = array<i32>} : memref<16x128xf32, #tpu.memory_space<vmem>>, vector<16x128xf32>,
    } else {
    }
    return
  }
  func.func @transform_0(%arg0: i32, %arg1: i32) -> (i32, i32) {
    %c0_i32 = arith.constant 0 : i32
    %c0_i32_0 = arith.constant 0 : i32
    return %arg0, %c0_i32 : i32, i32
  }
  func.func @transform_1(%arg0: i32, %arg1: i32) -> (i32, i32) {
    %c0_i32 = arith.constant 0 : i32
    %c0_i32_0 = arith.constant 0 : i32
    return %arg1, %c0_i32 : i32, i32
  }
  func.func @transform_2(%arg0: i32, %arg1: i32) -> (i32, i32) {
    %c0_i32 = arith.constant 0 : i32
    %c0_i32_0 = arith.constant 0 : i32
    return %c0_i32, %arg1 : i32, i32
  }
  func.func @transform_3(%arg0: i32, %arg1: i32) -> (i32, i32) {
    %c0_i32 = arith.constant 0 : i32
    %c0_i32_0 = arith.constant 0 : i32
    return %arg1, %c0_i32 : i32, i32
  }
  func.func @transform_4(%arg0: i32, %arg1: i32) -> (i32, i32) {
    %c0_i32 = arith.constant 0 : i32
    %c0_i32_0 = arith.constant 0 : i32
    %c0_i32_1 = arith.constant 0 : i32
    return %c0_i32, %c0_i32_0 : i32, i32
  }
  func.func @transform_5(%arg0: i32, %arg1: i32) -> (i32, i32) {
    %c0_i32 = arith.constant 0 : i32
    %c0_i32_0 = arith.constant 0 : i32
    return %arg0, %c0_i32 : i32, i32
  }
}

</mosaic_0001>

<bundles_post_ra>
// kernel: feed_forward_layer.1
= control target key start
LH: loop header
LB: loop body
LE: loop exit
PB: predicated region body
PF: predicated region fallthrough
CT: control target
= control target key end

     0   :  { %10 = vsyncpa [#allocation4], 0  ;;  %s749_s0 = inlined_call_operand.hbm [shape: bf16[16,128], index: 0, kind: input, shape index: {}]   ;;  %s750_s1 = inlined_call_operand.hbm [shape: bf16[128,128], index: 1, kind: input, shape index: {}]   ;;  %s751_s2 = inlined_call_operand.hbm [shape: f32[1,128], index: 2, kind: input, shape index: {}]   ;;  %s752_s3 = inlined_call_operand.hbm [shape: bf16[128,128], index: 3, kind: input, shape index: {}]   ;;  %s753_s4 = inlined_call_operand.hbm [shape: f32[1,128], index: 4, kind: input, shape index: {}]   ;;  %s754_s5 = inlined_call_operand.hbm [shape: f32[16,128], index: 5, kind: output, shape index: {}]  }
   0x1   :  { %11 = vsyncpa [#allocation7], 0 }
   0x2   :  { %12 = vsyncpa [#allocation10], 0 }
   0x3   :  { %13 = vsyncpa [#allocation5], 0  ;;  %s619_s18 = smov [#allocation6]   ;;  %s620_s20 = smov [#allocation9]  }
   0x4   :  { %s31_s19 = sshll.u32 %s619_s18, 4  ;;  %s53_s21 = sshll.u32 %s620_s20, 4  ;;  %s32_s19 = int_to_ptr.vmem [resolvable:$true] %s31_s19  ;;  %s661_s21 = int_to_ptr.vmem [resolvable:$true] %s53_s21 }
   0x5   :  { %s479_s24 = scalar_lea.hbm %s750_s1, 1024 }
   0x6   :  { %p480_p0 = scmp.ne.s32.totalorder %s750_s1, %s479_s24  ;;  %p483_p1 = scmp.lt.u32.totalorder %s479_s24, %s750_s1 }
   0x8   :  { %p485_p2 = pnand %p483_p1, %p480_p0 }
   0xa   :  { %488 = shalt.err (!%p485_p2)
}
   0xb   :  { %s489_s29 = scalar_lea.vmem %s32_s19, 1024  ;;  %p494_p4 = scmp.lt.s32.totalorder %s32_s19, %s32_s19 }
   0xc   :  { %p490_p3 = scmp.ne.s32.totalorder %s32_s19, %s489_s29  ;;  %p495_p5 = scmp.lt.s32.totalorder %s489_s29, %s489_s29 }
   0xe   :  { %p496_p6 = por %p495_p5, %p494_p4 }
  0x10   :  { %p497_p7 = pnand %p496_p6, %p490_p3 }
  0x12   :  { %500 = shalt.err (!%p497_p7)
}
  0x13   :  { %s621_s30 = smov 64   ;;  %s622_s6 = smov 4  }
  0x14   :  { %37 = dma.hbm_to_vmem [thread:$0]  %s750_s1, 1024, %s32_s19, [#allocation7], %s621_s30, %s621_s30, %s622_s6  }
  0x15   :  { %s501_s11 = scalar_lea.hbm %s752_s3, 1024 }
  0x16   :  { %p502_p8 = scmp.ne.s32.totalorder %s752_s3, %s501_s11  ;;  %p505_p9 = scmp.lt.u32.totalorder %s501_s11, %s752_s3 }
  0x18   :  { %p507_p10 = pnand %p505_p9, %p502_p8 }
  0x1a   :  { %510 = shalt.err (!%p507_p10)
}
  0x1b   :  { %s511_s16 = scalar_lea.vmem %s661_s21, 1024  ;;  %p516_p12 = scmp.lt.s32.totalorder %s661_s21, %s661_s21 }
  0x1c   :  { %p512_p11 = scmp.ne.s32.totalorder %s661_s21, %s511_s16  ;;  %p517_p13 = scmp.lt.s32.totalorder %s511_s16, %s511_s16 }
  0x1e   :  { %p518_p0 = por %p517_p13, %p516_p12 }
  0x20   :  { %p519_p1 = pnand %p518_p0, %p512_p11 }
  0x22   :  { %522 = shalt.err (!%p519_p1)
}
  0x23   :  { %59 = dma.hbm_to_vmem [thread:$0]  %s752_s3, 1024, %s661_s21, [#allocation10], %s621_s30, %s621_s30, %s622_s6  }
  0x24   :  { %s623_s18 = smov [#allocation3]   ;;  %s624_s20 = smov [#allocation8]  }
  0x25   :  { %s19_s19 = sshll.u32 %s623_s18, 4  ;;  %s44_s22 = sshll.u32 %s624_s20, 4  ;;  %s20_s19 = int_to_ptr.vmem [resolvable:$true] %s19_s19  ;;  %s45_s22 = int_to_ptr.vmem [resolvable:$true] %s44_s22 }
  0x26   :  { %s523_s25 = scalar_lea.hbm %s749_s0, 128 }
  0x27   :  { %p524_p2 = scmp.ne.s32.totalorder %s749_s0, %s523_s25  ;;  %p527_p3 = scmp.lt.u32.totalorder %s523_s25, %s749_s0 }
  0x29   :  { %p529_p4 = pnand %p527_p3, %p524_p2 }
  0x2b   :  { %532 = shalt.err (!%p529_p4)
}
  0x2c   :  { %s533_s3 = scalar_lea.vmem %s20_s19, 128  ;;  %p538_p6 = scmp.lt.s32.totalorder %s20_s19, %s20_s19 }
  0x2d   :  { %p534_p5 = scmp.ne.s32.totalorder %s20_s19, %s533_s3  ;;  %p539_p7 = scmp.lt.s32.totalorder %s533_s3, %s533_s3 }
  0x2f   :  { %p540_p8 = por %p539_p7, %p538_p6 }
  0x31   :  { %p541_p9 = pnand %p540_p8, %p534_p5 }
  0x33   :  { %544 = shalt.err (!%p541_p9)
}
  0x34   :  { %25 = dma.hbm_to_vmem [thread:$0]  %s749_s0, 128, %s20_s19, [#allocation4], %s621_s30, %s621_s30, %s622_s6  }
  0x35   :  { %s545_s10 = scalar_lea.hbm %s751_s2, 16 }
  0x36   :  { %p546_p10 = scmp.ne.s32.totalorder %s751_s2, %s545_s10  ;;  %p549_p11 = scmp.lt.u32.totalorder %s545_s10, %s751_s2 }
  0x38   :  { %p551_p12 = pnand %p549_p11, %p546_p10 }
  0x3a   :  { %554 = shalt.err (!%p551_p12)
}
  0x3b   :  { %s555_s15 = scalar_lea.vmem %s45_s22, 16  ;;  %s559_s16 = scalar_lea.vmem %s45_s22, 32 }
  0x3c   :  { %p556_p13 = scmp.ne.s32.totalorder %s45_s22, %s555_s15  ;;  %p560_p0 = scmp.lt.s32.totalorder %s45_s22, %s45_s22 }
  0x3d   :  { %p561_p1 = scmp.lt.s32.totalorder %s559_s16, %s555_s15 }
  0x3f   :  { %p562_p2 = por %p561_p1, %p560_p0 }
  0x41   :  { %p563_p3 = pnand %p562_p2, %p556_p13 }
  0x43   :  { %566 = shalt.err (!%p563_p3)
}
  0x44   :  { %47 = dma.hbm_to_vmem [thread:$0]  %s751_s2, 16, %s45_s22, [#allocation7]  }
  0x45   :  { %s625_s6 = smov [#allocation11]   ;;  %s567_s19 = scalar_lea.hbm %s753_s4, 16 }
  0x46   :  { %s66_s1 = sshll.u32 %s625_s6, 4  ;;  %p568_p4 = scmp.ne.s32.totalorder %s753_s4, %s567_s19  ;;  %s67_s1 = int_to_ptr.vmem [resolvable:$true] %s66_s1 }
  0x47   :  { %p571_p5 = scmp.lt.u32.totalorder %s567_s19, %s753_s4 }
  0x49   :  { %p573_p6 = pnand %p571_p5, %p568_p4 }
  0x4b   :  { %576 = shalt.err (!%p573_p6)
}
  0x4c   :  { %s577_s26 = scalar_lea.vmem %s67_s1, 16  ;;  %s581_s2 = scalar_lea.vmem %s67_s1, 32 }
  0x4d   :  { %p578_p7 = scmp.ne.s32.totalorder %s67_s1, %s577_s26  ;;  %p582_p8 = scmp.lt.s32.totalorder %s67_s1, %s67_s1 }
  0x4e   :  { %p583_p9 = scmp.lt.s32.totalorder %s581_s2, %s577_s26 }
  0x50   :  { %p584_p10 = por %p583_p9, %p582_p8 }
  0x52   :  { %p585_p11 = pnand %p584_p10, %p578_p7 }
  0x54   :  { %588 = shalt.err (!%p585_p11)
}
  0x55   :  { %69 = dma.hbm_to_vmem [thread:$0]  %s753_s4, 16, %s67_s1, [#allocation10]  }
  0x56   :  { %611 = dma.done.wait [#allocation4], 128  }
  0x57   :  { %612 = vsyncadd [#allocation4], 4294967168 }
  0x58   :  { %613 = dma.done.wait [#allocation7], 1040  }
  0x59   :  { %614 = vsyncadd [#allocation7], 4294966256 }
  0x5a   :  { %615 = dma.done.wait [#allocation10], 1040  }
  0x5b   :  { %616 = vsyncadd [#allocation10], 4294966256  ;;  %v626_v0 = vmov 0.0   ;;  %vm627_vm0 = vmmov 0   ;;  %v458_v1 = vld [vmem:[#allocation6] sm:$0xff]   ;;  %v459_v2 = vld [vmem:[#allocation6 + $0x8] sm:$0xff]  }
  0x5c   :  { %406 = vmatprep.subr.bf16.mxu0 %v626_v0  ;;  %422 = vmatprep.mubr.msk.bf16.mxu0 %vm627_vm0, %v626_v0  ;;  %v467_v3 = vld [vmem:[#allocation9] sm:$0xff]   ;;  %v468_v4 = vld [vmem:[#allocation9 + $0x8] sm:$0xff]   ;;  %v461_v6 = vld [vmem:[#allocation6 + $0x18] sm:$0xff]   ;;  %s628_s4 = smov [#allocation12]  }
  0x5d   :  { %426 = vmatprep.subr.bf16.mxu1 %v626_v0  ;;  %442 = vmatprep.mubr.msk.bf16.mxu1 %vm627_vm0, %v626_v0  ;;  %v460_v5 = vld [vmem:[#allocation6 + $0x10] sm:$0xff]   ;;  %v462_v7 = vld [vmem:[#allocation6 + $0x20] sm:$0xff]   ;;  %v463_v8 = vld [vmem:[#allocation6 + $0x28] sm:$0xff]   ;;  %s355_s28 = sshll.u32 %s628_s4, 4  ;;  %s356_s28 = int_to_ptr.vmem [resolvable:$true] %s355_s28 }
  0x5e   :  { %407 = vmatpush3.bf16.xpose.msra.mxu0 %v458_v1  ;;  %427 = vmatpush3.bf16.msra.mxu1 %v467_v3  ;;  %v464_v9 = vld [vmem:[#allocation6 + $0x30] sm:$0xff]   ;;  %v465_v10 = vld [vmem:[#allocation6 + $0x38] sm:$0xff]   ;;  %v471_v14 = vld [vmem:[#allocation9 + $0x20] sm:$0xff]   ;;  %s589_s29 = scalar_lea.vmem %s356_s28, 256  ;;  %p594_p13 = scmp.lt.s32.totalorder %s356_s28, %s356_s28 }
  0x5f   :  { %408 = vmatprep.subr.bf16.mxu0 %v626_v0  ;;  %428 = vmatprep.subr.bf16.mxu1 %v626_v0  ;;  %v466_v11 = vld [vmem:[#allocation3] sm:$0xff]   ;;  %v472_v15 = vld [vmem:[#allocation9 + $0x28] sm:$0xff]   ;;  %v369_v18 = vld [vmem:[#allocation8] ss:$0 sm:$0xff]  ;;  %p590_p12 = scmp.ne.s32.totalorder %s356_s28, %s589_s29  ;;  %p595_p0 = scmp.lt.s32.totalorder %s589_s29, %s589_s29 }
  0x60   :  { %v469_v12 = vld [vmem:[#allocation9 + $0x10] sm:$0xff]   ;;  %v470_v13 = vld [vmem:[#allocation9 + $0x18] sm:$0xff]   ;;  %v387_v36 = vld [vmem:[#allocation11] ss:$0 sm:$0xff] }
  0x61   :  { %v473_v16 = vld [vmem:[#allocation9 + $0x30] sm:$0xff]   ;;  %v474_v17 = vld [vmem:[#allocation9 + $0x38] sm:$0xff]   ;;  %p596_p1 = por %p595_p0, %p594_p13 }
  0x62   :  { %429 = vmatpush3.bf16.msra.mxu1 %v468_v4 }
  0x63   :  { %430 = vmatprep.subr.bf16.mxu1 %v626_v0  ;;  %p597_p2 = pnand %p596_p1, %p590_p12 }
  0x66   :  { %409 = vmatpush3.bf16.xpose.msra.mxu0 %v459_v2  ;;  %431 = vmatpush3.bf16.msra.mxu1 %v469_v12 }
  0x67   :  { %410 = vmatprep.subr.bf16.mxu0 %v626_v0  ;;  %432 = vmatprep.subr.bf16.mxu1 %v626_v0 }
  0x6a   :  { %433 = vmatpush3.bf16.msra.mxu1 %v470_v13 }
  0x6b   :  { %434 = vmatprep.subr.bf16.mxu1 %v626_v0 }
  0x6e   :  { %411 = vmatpush3.bf16.xpose.msra.mxu0 %v460_v5  ;;  %435 = vmatpush3.bf16.msra.mxu1 %v471_v14 }
  0x6f   :  { %412 = vmatprep.subr.bf16.mxu0 %v626_v0  ;;  %436 = vmatprep.subr.bf16.mxu1 %v626_v0 }
  0x72   :  { %437 = vmatpush3.bf16.msra.mxu1 %v472_v15 }
  0x73   :  { %438 = vmatprep.subr.bf16.mxu1 %v626_v0 }
  0x76   :  { %413 = vmatpush3.bf16.xpose.msra.mxu0 %v461_v6  ;;  %439 = vmatpush3.bf16.msra.mxu1 %v473_v16 }
  0x77   :  { %414 = vmatprep.subr.bf16.mxu0 %v626_v0  ;;  %440 = vmatprep.subr.bf16.mxu1 %v626_v0 }
  0x7a   :  { %441 = vmatpush3.bf16.msra.mxu1 %v474_v17 }
  0x7e   :  { %415 = vmatpush3.bf16.xpose.msra.mxu0 %v462_v7 }
  0x7f   :  { %416 = vmatprep.subr.bf16.mxu0 %v626_v0 }
  0x86   :  { %417 = vmatpush3.bf16.xpose.msra.mxu0 %v463_v8 }
  0x87   :  { %418 = vmatprep.subr.bf16.mxu0 %v626_v0 }
  0x8e   :  { %419 = vmatpush3.bf16.xpose.msra.mxu0 %v464_v9 }
  0x8f   :  { %420 = vmatprep.subr.bf16.mxu0 %v626_v0 }
  0x96   :  { %421 = vmatpush3.bf16.xpose.msra.mxu0 %v465_v10 }
  0x9d   :  { %423 = vmatmul.mubr.bf16.vlgmr.msra.gmra.mrb[0].mxu0 %v466_v11 }
 0x170   :  { %v205_v19 = vpop.f32.mrb[0].mxu0 }
 0x171   :  { %v206_v20 = vadd.f32 %v369_v18, %v205_v19  ;;  %v424_v21 = vpop.f32.mrb[1].mxu0 }
 0x172   :  { %v208_v22 = vpop.f32.mrb[2].mxu0 }
 0x173   :  { %v214_v23 = vmul.f32 0.70710677, %v206_v20  ;;  %v209_v24 = vadd.f32 %v369_v18, %v208_v22  ;;  %v425_v25 = vpop.f32.mrb[3].mxu0  ;;  %v212_v30 = vmul.f32 0.5, %v206_v20 }
 0x175   :  { %475 = verf.f32 %v214_v23  ;;  %v215_v26 = vmul.f32 0.70710677, %v209_v24  ;;  %v213_v31 = vmul.f32 0.5, %v209_v24 }
 0x177   :  { %477 = verf.f32 %v215_v26 }
 0x17f   :  { %v476_v27 = vpop.eup %475 }
 0x180   :  { %v218_v28 = vadd.f32 1.0, %v476_v27 }
 0x181   :  { %v478_v29 = vpop.eup %477 }
 0x182   :  { %v219_v32 = vadd.f32 1.0, %v478_v29  ;;  %v220_v33 = vmul.f32 %v218_v28, %v212_v30 }
 0x184   :  { %v221_v34 = vmul.f32 %v219_v32, %v213_v31 }
 0x186   :  { %v224_v35 = vpack.c.bf16 %v221_v34, %v220_v33 }
 0x188   :  { %443 = vmatmul.mubr.bf16.vlgmr.msra.gmra.mrb[0].mxu1 %v224_v35 }
 0x25b   :  { %v323_v37 = vpop.f32.mrb[0].mxu1 }
 0x25c   :  { %v346_v38 = vadd.f32 %v387_v36, %v323_v37  ;;  %v444_v39 = vpop.f32.mrb[1].mxu1 }
 0x25d   :  { %v326_v40 = vpop.f32.mrb[2].mxu1 }
 0x25e   :  { %348 = vst [vmem:[#allocation12] sm:$0xff] %v346_v38  ;;  %v347_v41 = vadd.f32 %v387_v36, %v326_v40  ;;  %v445_v42 = vpop.f32.mrb[3].mxu1 }
 0x260   :  { %349 = vst [vmem:[#allocation12 + $0x8] sm:$0xff] %v347_v41 }
 0x261   :  { %600 = shalt.err (!%p597_p2)
}
 0x262   :  { %s601_s7 = scalar_lea.hbm %s754_s5, 256 }
 0x263   :  { %p602_p3 = scmp.ne.s32.totalorder %s754_s5, %s601_s7  ;;  %p605_p4 = scmp.lt.u32.totalorder %s601_s7, %s754_s5 }
 0x265   :  { %p607_p5 = pnand %p605_p4, %p602_p3 }
 0x267   :  { %610 = shalt.err (!%p607_p5)
}
 0x268   :  { %s629_s12 = smov 128   ;;  %s630_s13 = smov 8  }
 0x269   :  { %361 = dma.vmem_to_hbm [thread:$0]  %s356_s28, 256, %s754_s5, [#allocation5], %s629_s12, %s629_s12, %s630_s13  }
 0x26a   :  { %617 = dma.done.wait [#allocation5], 256  }
 0x26b   :  { %618 = vsyncadd [#allocation5], 4294967040 }
 0x26c   :  { %365 = vsyncpa [#allocation4], 1 }
 0x26d   :  { %366 = vsyncpa [#allocation7], 1 }
 0x26e   :  { %367 = vsyncpa [#allocation10], 1 }
 0x26f   :  { %368 = vsyncpa [#allocation5], 1 }

</bundles_post_ra>
